<compile_context>
chip_gen: v6e
topology: v6e:2x2x1
jax: 0.10.0
libtpu: 0.0.40
codegen_flags: <defaults>
</compile_context>

<pallas_src>
import jax
import jax.numpy as jnp
from jax.experimental import pallas as pl
from jax.experimental.pallas import tpu as pltpu


def _readout_kernel(feats_ref, counts_ref, w_ref, b_ref, out_ref):
    # feats_ref : (GB, N, D) f32   counts_ref: (GB, 1, D) i32
    # w_ref     : (1, D)     f32   b_ref     : (1, 1)     f32 (SMEM)
    # out_ref   : (GB, 2*D)  f32
    x = feats_ref[...]                      # (GB, N, D)
    counts = counts_ref[...]                # (GB, 1, D)
    w = w_ref[...]                          # (1, D)
    b = b_ref[0, 0]                         # scalar

    N = x.shape[1]
    D = x.shape[2]

    # Per-node gate: sigmoid(<x_node, w> + b). VPU multiply + lane reduce (no MXU).
    logits = jnp.sum(x * w, axis=-1, keepdims=True) + b     # (GB, N, 1)
    atom_w = jax.nn.sigmoid(logits)                         # (GB, N, 1)

    # Weighted sum over nodes. Feats are zero-padded, so pad rows contribute 0
    # (sigmoid(b) * 0 == 0) and no mask multiply is needed here.
    wsum = jnp.sum(x * atom_w, axis=1)                      # (GB, D)

    # Max over real nodes: mask pad rows to -inf using node-index < count.
    node_id = jax.lax.broadcasted_iota(jnp.int32, (N, D), 0)      # (N, D)
    valid = node_id < counts                                      # (GB, N, D)
    hmax = jnp.max(jnp.where(valid, x, -jnp.inf), axis=1)         # (GB, D)

    # Direct slice stores (no concatenate / extra VMEM temp).
    out_ref[:, :D] = wsum
    out_ref[:, D:] = hmax


def weighted_sum_and_max(feats, num_nodes, w, b, *, block_graphs=None):
    """feats: (B, N, D) f32 zero-padded, num_nodes: (B,) int, w: (D,1), b: (1,1) -> (B, 2D)."""
    feats = jnp.asarray(feats, jnp.float32)
    num_nodes = jnp.asarray(num_nodes, jnp.int32)
    B, N, D = feats.shape
    w_row = jnp.asarray(w, jnp.float32).reshape(1, D)
    b_s = jnp.asarray(b, jnp.float32).reshape(1, 1)

    # Choose graphs-per-block so the feats tile is a few MiB (amortizes the
    # ~0.35us/step pipeline overhead) while the double-buffered working set
    # stays well under the v7x 64 MiB VMEM ceiling. Keep >= 2 grid steps when
    # the batch allows it so both v7x TensorCores get work.
    per_graph_bytes = N * D * 4
    if block_graphs is None:
        gb = max(1, (4 * 1024 * 1024) // per_graph_bytes)   # ~4 MiB feats tile target
        if B >= 16:
            gb = min(gb, pl.cdiv(B, 2))
        gb = min(gb, max(B, 1))
    else:
        gb = int(block_graphs)
    gb = max(8, (gb // 8) * 8)            # sublane-aligned (GB, 2D) output block
    Bp = pl.cdiv(B, gb) * gb

    if Bp != B:                           # pad batch; padded graphs have 0 nodes
        feats = jnp.pad(feats, ((0, Bp - B), (0, 0), (0, 0)))
        num_nodes = jnp.pad(num_nodes, (0, Bp - B))

    # Per-graph node counts, replicated along the feature (lane) axis so the
    # in-kernel mask build needs no lane-dim-1 tiles or relayouts.
    counts = jnp.broadcast_to(num_nodes[:, None, None], (Bp, 1, D)).astype(jnp.int32)

    grid = (Bp // gb,)
    out = pl.pallas_call(
        _readout_kernel,
        out_shape=jax.ShapeDtypeStruct((Bp, 2 * D), jnp.float32),
        grid_spec=pltpu.PrefetchScalarGridSpec(
            num_scalar_prefetch=0,
            grid=grid,
            in_specs=[
                pl.BlockSpec((gb, N, D), lambda g: (g, 0, 0)),     # feats
                pl.BlockSpec((gb, 1, D), lambda g: (g, 0, 0)),     # node counts
                pl.BlockSpec((1, D), lambda g: (0, 0)),            # weight row
                pl.BlockSpec(memory_space=pltpu.MemorySpace.SMEM), # bias scalar
            ],
            out_specs=pl.BlockSpec((gb, 2 * D), lambda g: (g, 0)),
        ),
        compiler_params=pltpu.CompilerParams(
            dimension_semantics=("parallel",),
            vmem_limit_bytes=48 * 1024 * 1024,
        ),
        cost_estimate=pl.CostEstimate(
            flops=int(5 * Bp * N * D),
            transcendentals=int(Bp * N),
            bytes_accessed=int(feats.size * 4 + counts.size * 4 + Bp * 2 * D * 4),
        ),
    )(feats, counts, w_row, b_s)
    return out[:B]


def reference(feats, num_nodes, w, b):
    N = feats.shape[1]
    mask = (jnp.arange(N)[None, :] < num_nodes[:, None]).astype(jnp.float32)[..., None]
    logits = feats @ w + b[0, 0]                        # (B, N, 1)
    atom_w = jax.nn.sigmoid(logits)
    wsum = jnp.sum(feats * atom_w * mask, axis=1)       # (B, D)
    hmax = jnp.max(jnp.where(mask > 0, feats, -jnp.inf), axis=1)
    return jnp.concatenate([wsum, hmax], axis=1)


if __name__ == "__main__":
    key = jax.random.PRNGKey(0)
    B, N, D = 6, 8, 32    # 6 graphs, up to 8 nodes each, in_feats = 32

    k_feats, k_w, k_b = jax.random.split(key, 3)
    feats = jax.random.normal(k_feats, (B, N, D), dtype=jnp.float32)

    # Ragged node counts per graph; zero out padding rows (dense packing invariant).
    num_nodes = jnp.array([8, 5, 3, 8, 1, 6], dtype=jnp.int32)
    row_mask = (jnp.arange(N)[None, :] < num_nodes[:, None]).astype(jnp.float32)[..., None]
    feats = feats * row_mask

    # Deterministic Linear(in_feats, 1) params (PyTorch-style uniform init).
    bound = 1.0 / jnp.sqrt(jnp.float32(D))
    w = jax.random.uniform(k_w, (D, 1), jnp.float32, minval=-bound, maxval=bound)
    b = jax.random.uniform(k_b, (1, 1), jnp.float32, minval=-bound, maxval=bound)

    out = weighted_sum_and_max(feats, num_nodes, w, b)
    jax.block_until_ready(out)

    ref = reference(feats, num_nodes, w, b)
    assert out.shape == (B, 2 * D)
    assert jnp.allclose(out, ref, atol=1e-5, rtol=1e-5)
    print("KERNEL_OK")
</pallas_src>

<mosaic_0001>
module attributes {stable_mosaic.version = 11 : i64} {
  func.func @_readout_kernel(%arg0: i32, %arg1: memref<8x8x32xf32, #tpu.memory_space<vmem>>, %arg2: memref<8x1x32xi32, #tpu.memory_space<vmem>>, %arg3: memref<1x32xf32, #tpu.memory_space<vmem>>, %arg4: memref<1x1xf32, #tpu.memory_space<smem>>, %arg5: memref<8x64xf32, #tpu.memory_space<vmem>>) attributes {dimension_semantics = [#tpu.dimension_semantics<parallel>], iteration_bounds = array<i64: 1>, scalar_prefetch = 0 : i64, scratch_operands = 0 : i64, tpu.core_type = #tpu.core_type<tc>, window_params = [{transform_indices = @transform_0, window_bounds = array<i64: 8, 8, 32>}, {transform_indices = @transform_1, window_bounds = array<i64: 8, 1, 32>}, {pipeline_mode = #tpu.pipeline_mode<synchronous>, transform_indices = @transform_2, window_bounds = array<i64: 1, 32>}, {transform_indices = @transform_3, window_bounds = array<i64: 1, 1>}, {transform_indices = @transform_4, window_bounds = array<i64: 8, 64>}]} {
    %c0 = arith.constant 0 : index
    %c0_0 = arith.constant 0 : index
    %c0_1 = arith.constant 0 : index
    %0 = vector.load %arg1[%c0, %c0_0, %c0_1] : memref<8x8x32xf32, #tpu.memory_space<vmem>>, vector<8x8x32xf32>
    %c0_2 = arith.constant 0 : index
    %c0_3 = arith.constant 0 : index
    %c0_4 = arith.constant 0 : index
    %1 = vector.load %arg2[%c0_2, %c0_3, %c0_4] : memref<8x1x32xi32, #tpu.memory_space<vmem>>, vector<8x1x32xi32>
    %c0_5 = arith.constant 0 : index
    %c0_6 = arith.constant 0 : index
    %2 = vector.load %arg3[%c0_5, %c0_6] : memref<1x32xf32, #tpu.memory_space<vmem>>, vector<1x32xf32>
    %c0_7 = arith.constant 0 : index
    %c0_8 = arith.constant 0 : index
    %3 = memref.load %arg4[%c0_7, %c0_8] : memref<1x1xf32, #tpu.memory_space<smem>>
    %4 = vector.shape_cast %2 : vector<1x32xf32> to vector<1x1x32xf32>
    %5 = vector.broadcast %4 : vector<1x1x32xf32> to vector<8x8x32xf32>
    %6 = arith.mulf %0, %5 : vector<8x8x32xf32>
    %cst = arith.constant dense<0.000000e+00> : vector<8x8xf32>
    %7 = vector.multi_reduction <add>, %6, %cst [2] : vector<8x8x32xf32> to vector<8x8xf32>
    %8 = vector.shape_cast %7 : vector<8x8xf32> to vector<8x8x1xf32>
    %9 = vector.broadcast %3 : f32 to vector<8x8x1xf32>
    %10 = arith.addf %8, %9 : vector<8x8x1xf32>
    %11 = arith.negf %10 : vector<8x8x1xf32>
    %12 = math.exp %11 : vector<8x8x1xf32>
    %cst_9 = arith.constant 1.000000e+00 : f32
    %13 = vector.broadcast %cst_9 : f32 to vector<8x8x1xf32>
    %14 = arith.addf %13, %12 : vector<8x8x1xf32>
    %15 = arith.divf %13, %14 : vector<8x8x1xf32>
    %16 = vector.broadcast %15 : vector<8x8x1xf32> to vector<8x8x32xf32>
    %17 = arith.mulf %0, %16 : vector<8x8x32xf32>
    %cst_10 = arith.constant dense<0.000000e+00> : vector<8x32xf32>
    %18 = vector.multi_reduction <add>, %17, %cst_10 [1] : vector<8x8x32xf32> to vector<8x32xf32>
    %19 = tpu.iota {dimensions = array<i32: 0>} : vector<8x32xi32>
    %20 = vector.shape_cast %19 : vector<8x32xi32> to vector<1x8x32xi32>
    %21 = vector.broadcast %20 : vector<1x8x32xi32> to vector<8x8x32xi32>
    %22 = vector.broadcast %1 : vector<8x1x32xi32> to vector<8x8x32xi32>
    %23 = arith.cmpi slt, %21, %22 : vector<8x8x32xi32>
    %cst_11 = arith.constant 0xFF800000 : f32
    %24 = vector.broadcast %cst_11 : f32 to vector<8x8x32xf32>
    %25 = arith.select %23, %0, %24 : vector<8x8x32xi1>, vector<8x8x32xf32>
    %cst_12 = arith.constant dense<0xFF800000> : vector<8x32xf32>
    %26 = vector.multi_reduction <maximumf>, %25, %cst_12 [1] : vector<8x8x32xf32> to vector<8x32xf32>
    %c0_13 = arith.constant 0 : index
    %c0_14 = arith.constant 0 : index
    %27 = vector.load %arg5[%c0_13, %c0_14] : memref<8x64xf32, #tpu.memory_space<vmem>>, vector<8x32xf32>
    tpu.vector_store %arg5[%c0_13, %c0_14], %18 {strides = array<i32>} : memref<8x64xf32, #tpu.memory_space<vmem>>, vector<8x32xf32>,
    %c0_15 = arith.constant 0 : index
    %c32 = arith.constant 32 : index
    %28 = vector.load %arg5[%c0_15, %c32] : memref<8x64xf32, #tpu.memory_space<vmem>>, vector<8x32xf32>
    tpu.vector_store %arg5[%c0_15, %c32], %26 {strides = array<i32>} : memref<8x64xf32, #tpu.memory_space<vmem>>, vector<8x32xf32>,
    return
  }
  func.func @transform_0(%arg0: i32) -> (i32, i32, i32) {
    %c0_i32 = arith.constant 0 : i32
    %c0_i32_0 = arith.constant 0 : i32
    %c0_i32_1 = arith.constant 0 : i32
    return %arg0, %c0_i32, %c0_i32_0 : i32, i32, i32
  }
  func.func @transform_1(%arg0: i32) -> (i32, i32, i32) {
    %c0_i32 = arith.constant 0 : i32
    %c0_i32_0 = arith.constant 0 : i32
    %c0_i32_1 = arith.constant 0 : i32
    return %arg0, %c0_i32, %c0_i32_0 : i32, i32, i32
  }
  func.func @transform_2(%arg0: i32) -> (i32, i32) {
    %c0_i32 = arith.constant 0 : i32
    %c0_i32_0 = arith.constant 0 : i32
    %c0_i32_1 = arith.constant 0 : i32
    return %c0_i32, %c0_i32_0 : i32, i32
  }
  func.func @transform_3(%arg0: i32) -> (i32, i32) {
    %c0_i32 = arith.constant 0 : i32
    %c0_i32_0 = arith.constant 0 : i32
    %c0_i32_1 = arith.constant 0 : i32
    return %c0_i32, %c0_i32_0 : i32, i32
  }
  func.func @transform_4(%arg0: i32) -> (i32, i32) {
    %c0_i32 = arith.constant 0 : i32
    %c0_i32_0 = arith.constant 0 : i32
    return %arg0, %c0_i32 : i32, i32
  }
}

</mosaic_0001>

<bundles_post_ra>
// kernel: tpu_custom_call.1
= control target key start
LH: loop header
LB: loop body
LE: loop exit
PB: predicated region body
PF: predicated region fallthrough
CT: control target
= control target key end

     0   :  { %10 = vsyncpa [#allocation4], 0  ;;  %s661_s0 = inlined_call_operand.hbm [shape: f32[8,8,32], index: 0, kind: input, shape index: {}]   ;;  %s662_s1 = inlined_call_operand.hbm [shape: s32[8,1,32], index: 1, kind: input, shape index: {}]   ;;  %s663_s2 = inlined_call_operand.vmem [shape: f32[1,32], index: 2, kind: input, shape index: {}]   ;;  %s664_s3 = inlined_call_operand.<no memory space> [shape: f32[1,1], index: 3, kind: input, shape index: {}]   ;;  %s665_s4 = inlined_call_operand.hbm [shape: f32[8,64], index: 4, kind: output, shape index: {}]  }
   0x1   :  { %11 = vsyncpa [#allocation7], 0 }
   0x2   :  { %12 = vsyncpa [#allocation5], 0  ;;  %s514_s15 = smov [#allocation3]  }
   0x3   :  { %s18_s16 = sshll.u32 %s514_s15, 4  ;;  %s19_s16 = int_to_ptr.vmem [resolvable:$true] %s18_s16 }
   0x4   :  { %s456_s17 = scalar_lea.vmem %s19_s16, 1024  ;;  %p461_p1 = scmp.lt.s32.totalorder %s19_s16, %s19_s16 }
   0x5   :  { %p457_p0 = scmp.ne.s32.totalorder %s19_s16, %s456_s17  ;;  %p462_p2 = scmp.lt.s32.totalorder %s456_s17, %s456_s17 }
   0x7   :  { %p463_p3 = por %p462_p2, %p461_p1 }
   0x9   :  { %p464_p4 = pnand %p463_p3, %p457_p0 }
   0xb   :  { %467 = shalt.err (!%p464_p4)
}
   0xc   :  { %s515_s18 = smov 128   ;;  %s516_s19 = smov 8  }
   0xd   :  { %24 = dma.hbm_to_vmem [thread:$0]  %s661_s0, 1024, %s19_s16, [#allocation4], %s515_s18, %s515_s18, %s516_s19  }
   0xe   :  { %s517_s22 = smov [#allocation6]  }
   0xf   :  { %s30_s23 = sshll.u32 %s517_s22, 4  ;;  %s31_s23 = int_to_ptr.vmem [resolvable:$true] %s30_s23 }
  0x10   :  { %s476_s24 = scalar_lea.vmem %s31_s23, 128  ;;  %p481_p6 = scmp.lt.s32.totalorder %s31_s23, %s31_s23 }
  0x11   :  { %p477_p5 = scmp.ne.s32.totalorder %s31_s23, %s476_s24  ;;  %p482_p7 = scmp.lt.s32.totalorder %s476_s24, %s476_s24 }
  0x13   :  { %p483_p8 = por %p482_p7, %p481_p6 }
  0x15   :  { %p484_p9 = pnand %p483_p8, %p477_p5 }
  0x17   :  { %487 = shalt.err (!%p484_p9)
}
  0x18   :  { %s518_s25 = smov 16   ;;  %s519_s26 = smov 1  }
  0x19   :  { %36 = dma.hbm_to_vmem [thread:$0]  %s662_s1, 128, %s31_s23, [#allocation7], %s518_s25, %s518_s25, %s519_s26  }
  0x1a   :  { %508 = dma.done.wait [#allocation4], 1024  }
  0x1b   :  { %509 = vsyncadd [#allocation4], 4294966272 }
  0x1c   :  { %510 = dma.done.wait [#allocation7], 128  }
  0x1d   :  { %511 = vsyncadd [#allocation7], 4294967168  ;;  %v225_v0 = vlaneseq  ;;  %v555_v2 = vld [vmem:[#allocation3 + $0x10] sm:$0xff]  ;;  %v402_v3 = vld [vmem:[#allocation6 + $0x2] ss:$0 sm:$0xff]  ;;  %vm79_vm0 = vcmask 261120  }
  0x1e   :  { %v560_v4 = vld [vmem:[%s663_s2] ss:$0 sm:$0xff]  ;;  %v567_v8 = vld [vmem:[#allocation3 + $0x18] sm:$0xff]  ;;  %v403_v11 = vld [vmem:[#allocation6 + $0x3] ss:$0 sm:$0xff]  ;;  %vm339_vm9 = vcmask 1041409  }
  0x1f   :  { %v553_v1 = vshrl.u32 %v225_v0, 7  ;;  %v73_v5 = vmul.f32 %v560_v4, %v555_v2  ;;  %v565_v6 = vld [vmem:[#allocation3] sm:$0xff]  ;;  %v74_v12 = vmul.f32 %v560_v4, %v567_v8  ;;  %v575_v13 = vld [vmem:[#allocation3 + $0x8] sm:$0xff]  ;;  %v603_v44 = vld [vmem:[#allocation3 + $0x38] sm:$0xff]  ;;  %vm341_vm10 = vcmask 1042434   ;;  %s520_s1 = smov 32  }
  0x20   :  { %v400_v7 = vld [vmem:[#allocation6] ss:$0 sm:$0xff]  ;;  %v71_v10 = vmul.f32 %v560_v4, %v565_v6  ;;  %v401_v14 = vld [vmem:[#allocation6 + $0x1] ss:$0 sm:$0xff]  ;;  %v581_v18 = vld [vmem:[#allocation3 + $0x28] sm:$0xff]  ;;  %v72_v25 = vmul.f32 %v560_v4, %v575_v13  ;;  %v78_v55 = vmul.f32 %v560_v4, %v603_v44  ;;  %vm343_vm11 = vcmask 1043459  }
  0x21   :  { %vm261_vm1 = vcmp.lt.s32.totalorder %v553_v1, %v402_v3  ;;  %vm259_vm2 = vcmp.lt.s32.totalorder %v553_v1, %v400_v7  ;;  %v86_v15 = vsel %vm79_vm0, %v73_v5, 0.0  ;;  %vm262_vm3 = vcmp.lt.s32.totalorder %v553_v1, %v403_v11  ;;  %v405_v26 = vld [vmem:[#allocation6 + $0x5] ss:$0 sm:$0xff]  ;;  %v404_v36 = vld [vmem:[#allocation6 + $0x4] ss:$0 sm:$0xff]  ;;  %v612_v60 = vld [vmem:[#allocation3 + $0x30] sm:$0xff] }
  0x22   :  { %v269_v9 = vsel %vm261_vm1, %v555_v2, -inf  ;;  %v267_v17 = vsel %vm259_vm2, %v565_v6, -inf  ;;  %87 = vadd.xlane.f32.xlu1 %v86_v15  ;;  %v80_v20 = vsel %vm79_vm0, %v71_v10, 0.0  ;;  %v89_v22 = vsel %vm79_vm0, %v74_v12, 0.0  ;;  %v594_v31 = vld [vmem:[#allocation3 + $0x20] sm:$0xff] }
  0x23   :  { %v289_v16 = vsel %vm79_vm0, %v269_v9, -inf  ;;  %v275_v21 = vsel %vm79_vm0, %v267_v17, -inf  ;;  %81 = vadd.xlane.f32.xlu0 %v80_v20  ;;  %v270_v24 = vsel %vm262_vm3, %v567_v8, -inf  ;;  %vm260_vm4 = vcmp.lt.s32.totalorder %v553_v1, %v401_v14  ;;  %v407_v54 = vld [vmem:[#allocation6 + $0x7] ss:$0 sm:$0xff] }
  0x24   :  { %v290_v19 = vrot.slane %v289_v16, 4  ;;  %v276_v23 = vrot.slane %v275_v21, 4  ;;  %v296_v28 = vsel %vm79_vm0, %v270_v24, -inf  ;;  %v268_v29 = vsel %vm260_vm4, %v575_v13, -inf  ;;  %v406_v0 = vld [vmem:[#allocation6 + $0x6] ss:$0 sm:$0xff] }
  0x25   :  { %v76_v30 = vmul.f32 %v560_v4, %v581_v18  ;;  %v297_v33 = vrot.slane %v296_v28, 4  ;;  %v83_v34 = vsel %vm79_vm0, %v72_v25, 0.0  ;;  %v282_v35 = vsel %vm79_vm0, %v268_v29, -inf }
  0x26   :  { %v291_v27 = vmax.f32 %v289_v16, %v290_v19  ;;  %v277_v32 = vmax.f32 %v275_v21, %v276_v23  ;;  %90 = vadd.xlane.f32.xlu1 %v89_v22  ;;  %v283_v38 = vrot.slane %v282_v35, 4  ;;  %vm264_vm5 = vcmp.lt.s32.totalorder %v553_v1, %v405_v26 }
  0x27   :  { %v95_v39 = vsel %vm79_vm0, %v76_v30, 0.0  ;;  %v298_v41 = vmax.f32 %v296_v28, %v297_v33  ;;  %84 = vadd.xlane.f32.xlu0 %v83_v34  ;;  %v272_v42 = vsel %vm264_vm5, %v581_v18, -inf  ;;  %v75_v43 = vmul.f32 %v560_v4, %v594_v31 }
  0x28   :  { %v292_v37 = vrot.slane %v291_v27, 2  ;;  %v278_v40 = vrot.slane %v277_v32, 2  ;;  %v284_v46 = vmax.f32 %v282_v35, %v283_v38  ;;  %v310_v47 = vsel %vm79_vm0, %v272_v42, -inf }
  0x29   :  { %vm263_vm6 = vcmp.lt.s32.totalorder %v553_v1, %v404_v36  ;;  %v299_v49 = vrot.slane %v298_v41, 2  ;;  %v311_v50 = vrot.slane %v310_v47, 4  ;;  %v92_v51 = vsel %vm79_vm0, %v75_v43, 0.0 }
  0x2a   :  { %v293_v45 = vmax.f32 %v291_v27, %v292_v37  ;;  %v279_v48 = vmax.f32 %v277_v32, %v278_v40  ;;  %v285_v52 = vrot.slane %v284_v46, 2  ;;  %96 = vadd.xlane.f32.xlu1 %v95_v39  ;;  %v271_v53 = vsel %vm263_vm6, %v594_v31, -inf }
  0x2b   :  { %v300_v57 = vmax.f32 %v298_v41, %v299_v49  ;;  %v312_v58 = vmax.f32 %v310_v47, %v311_v50  ;;  %v303_v59 = vsel %vm79_vm0, %v271_v53, -inf  ;;  %93 = vadd.xlane.f32.xlu0 %v92_v51  ;;  %v101_v63 = vsel %vm79_vm0, %v78_v55, 0.0 }
  0x2c   :  { %v280_v56 = vrot.slane %v279_v48, 1  ;;  %v286_v61 = vmax.f32 %v284_v46, %v285_v52  ;;  %v304_v62 = vrot.slane %v303_v59, 4  ;;  %v294_v3 = vrot.slane %v293_v45, 1 }
  0x2d   :  { %v313_v7 = vrot.slane %v312_v58, 2  ;;  %vm266_vm7 = vcmp.lt.s32.totalorder %v553_v1, %v407_v54  ;;  %v77_v12 = vmul.f32 %v560_v4, %v612_v60  ;;  %v301_v14 = vrot.slane %v300_v57, 1 }
  0x2e   :  { %v281_v5 = vmax.f32 %v279_v48, %v280_v56  ;;  %v287_v9 = vrot.slane %v286_v61, 1  ;;  %v305_v10 = vmax.f32 %v303_v59, %v304_v62  ;;  %v274_v11 = vsel %vm266_vm7, %v603_v44, -inf  ;;  %102 = vadd.xlane.f32.xlu1 %v101_v63 }
  0x2f   :  { %v324_v15 = vsel %vm79_vm0, %v274_v11, -inf  ;;  %vm265_vm8 = vcmp.lt.s32.totalorder %v553_v1, %v406_v0  ;;  %v98_v20 = vsel %vm79_vm0, %v77_v12, 0.0  ;;  %v295_v21 = vmax.f32 %v293_v45, %v294_v3 }
  0x30   :  { %v288_v16 = vmax.f32 %v286_v61, %v287_v9  ;;  %v306_v17 = vrot.slane %v305_v10, 2  ;;  %v325_v19 = vrot.slane %v324_v15, 4  ;;  %v314_v22 = vmax.f32 %v312_v58, %v313_v7  ;;  %99 = vadd.xlane.f32.xlu0 %v98_v20 }
  0x31   :  { %v273_v23 = vsel %vm265_vm8, %v612_v60, -inf  ;;  %v302_v1 = vmax.f32 %v300_v57, %v301_v14  ;;  %vm345_vm12 = vcmask 1044484   ;;  %vm347_vm13 = vcmask 1045509  }
  0x32   :  { %v307_v24 = vmax.f32 %v305_v10, %v306_v17  ;;  %v326_v25 = vmax.f32 %v324_v15, %v325_v19  ;;  %v317_v4 = vsel %vm79_vm0, %v273_v23, -inf  ;;  %v363_v26 = vsel %vm339_vm9, %v288_v16, %v281_v5 }
  0x33   :  { %v318_v27 = vrot.slane %v317_v4, 4  ;;  %v364_v32 = vsel %vm341_vm10, %v295_v21, %v363_v26  ;;  %v315_v33 = vrot.slane %v314_v22, 1  ;;  %vm349_vm14 = vcmask 1046534  }
  0x34   :  { %v308_v28 = vrot.slane %v307_v24, 1  ;;  %v327_v29 = vrot.slane %v326_v25, 2  ;;  %v365_v37 = vsel %vm343_vm11, %v302_v1, %v364_v32  ;;  %vm351_vm15 = vcmask 1047559  }
  0x35   :  { %v319_v30 = vmax.f32 %v317_v4, %v318_v27  ;;  %v316_v39 = vmax.f32 %v314_v22, %v315_v33  ;;  %v104_v49 = vstv %s664_s3  ;;  %s521_s3 = smov [#allocation8]   ;;  %vm373_vm1 = vcmask 523520  }
  0x36   :  { %v309_v35 = vmax.f32 %v307_v24, %v308_v28  ;;  %v328_v36 = vmax.f32 %v326_v25, %v327_v29  ;;  %s381_s5 = sshll.u32 %s521_s3, 4  ;;  %s382_s5 = int_to_ptr.vmem [resolvable:$true] %s381_s5 }
  0x37   :  { %v320_v34 = vrot.slane %v319_v30, 2  ;;  %s488_s6 = scalar_lea.vmem %s382_s5, 128  ;;  %p493_p11 = scmp.lt.s32.totalorder %s382_s5, %s382_s5 }
  0x38   :  { %v366_v41 = vsel %vm345_vm12, %v309_v35, %v365_v37  ;;  %v329_v42 = vrot.slane %v328_v36, 1  ;;  %p489_p10 = scmp.ne.s32.totalorder %s382_s5, %s488_s6  ;;  %p494_p12 = scmp.lt.s32.totalorder %s488_s6, %s488_s6 }
  0x39   :  { %v321_v38 = vmax.f32 %v319_v30, %v320_v34  ;;  %v367_v45 = vsel %vm347_vm13, %v316_v39, %v366_v41 }
  0x3a   :  { %v330_v46 = vmax.f32 %v328_v36, %v329_v42  ;;  %p495_p13 = por %p494_p12, %p493_p11 }
  0x3b   :  { %v322_v40 = vrot.slane %v321_v38, 1 }
  0x3c   :  { %p496_p0 = pnand %p495_p13, %p489_p10 }
  0x3d   :  { %v323_v43 = vmax.f32 %v321_v38, %v322_v40 }
  0x3f   :  { %v368_v47 = vsel %vm349_vm14, %v323_v43, %v367_v45 }
  0x40   :  { %v369_v48 = vsel %vm351_vm15, %v330_v46, %v368_v47 }
  0x46   :  { %370 = vrot.lane.b32.xlu0 %v369_v48, %s520_s1 }
  0xab   :  { %v88_v50 = vpop.xlane.xlu1 %87 }
  0xac   :  { %v107_v51 = vadd.f32 %v104_v49, %v88_v50  ;;  %v82_v52 = vpop.xlane.xlu0 %81 }
  0xad   :  { %v105_v53 = vadd.f32 %v104_v49, %v82_v52 }
  0xae   :  { %v394_v54 = vmul.f32 -1.442695, %v107_v51 }
  0xaf   :  { %v392_v55 = vmul.f32 -1.442695, %v105_v53  ;;  %v91_v56 = vpop.xlane.xlu1 %90 }
  0xb0   :  { %416 = vpow2.f32 %v394_v54  ;;  %v108_v57 = vadd.f32 %v104_v49, %v91_v56  ;;  %v85_v58 = vpop.xlane.xlu0 %84 }
  0xb1   :  { %418 = vpow2.f32 %v392_v55  ;;  %v106_v59 = vadd.f32 %v104_v49, %v85_v58 }
  0xb2   :  { %v395_v61 = vmul.f32 -1.442695, %v108_v57 }
  0xb3   :  { %v393_v62 = vmul.f32 -1.442695, %v106_v59  ;;  %v97_v63 = vpop.xlane.xlu1 %96 }
  0xb4   :  { %420 = vpow2.f32 %v395_v61  ;;  %v110_v0 = vadd.f32 %v104_v49, %v97_v63  ;;  %v94_v3 = vpop.xlane.xlu0 %93 }
  0xb5   :  { %422 = vpow2.f32 %v393_v62  ;;  %v109_v5 = vadd.f32 %v104_v49, %v94_v3 }
  0xb6   :  { %v397_v7 = vmul.f32 -1.442695, %v110_v0 }
  0xb7   :  { %v396_v9 = vmul.f32 -1.442695, %v109_v5  ;;  %v103_v10 = vpop.xlane.xlu1 %102 }
  0xb8   :  { %424 = vpow2.f32 %v397_v7  ;;  %v112_v11 = vadd.f32 %v104_v49, %v103_v10 }
  0xb9   :  { %426 = vpow2.f32 %v396_v9  ;;  %v100_v14 = vpop.xlane.xlu0 %99 }
  0xba   :  { %v399_v12 = vmul.f32 -1.442695, %v112_v11  ;;  %v111_v15 = vadd.f32 %v104_v49, %v100_v14 }
  0xbc   :  { %428 = vpow2.f32 %v399_v12  ;;  %v398_v17 = vmul.f32 -1.442695, %v111_v15 }
  0xbd   :  { %v417_v16 = vpop.eup %416 }
  0xbe   :  { %v419_v19 = vpop.eup %418  ;;  %v139_v20 = vadd.f32 1.0, %v417_v16  ;;  %430 = vpow2.f32 %v398_v17 }
  0xbf   :  { %v137_v21 = vadd.f32 1.0, %v419_v19 }
  0xc0   :  { %432 = vrcp.f32 %v139_v20 }
  0xc1   :  { %v421_v22 = vpop.eup %420  ;;  %434 = vrcp.f32 %v137_v21 }
  0xc2   :  { %v423_v23 = vpop.eup %422  ;;  %v140_v24 = vadd.f32 1.0, %v421_v22 }
  0xc3   :  { %v138_v25 = vadd.f32 1.0, %v423_v23 }
  0xc4   :  { %436 = vrcp.f32 %v140_v24 }
  0xc5   :  { %v425_v4 = vpop.eup %424  ;;  %438 = vrcp.f32 %v138_v25 }
  0xc6   :  { %v427_v26 = vpop.eup %426  ;;  %v142_v27 = vadd.f32 1.0, %v425_v4 }
  0xc7   :  { %v141_v1 = vadd.f32 1.0, %v427_v26 }
  0xc8   :  { %440 = vrcp.f32 %v142_v27 }
  0xc9   :  { %v429_v28 = vpop.eup %428  ;;  %442 = vrcp.f32 %v141_v1 }
  0xca   :  { %v144_v29 = vadd.f32 1.0, %v429_v28 }
  0xcb   :  { %v431_v30 = vpop.eup %430 }
  0xcc   :  { %444 = vrcp.f32 %v144_v29  ;;  %v143_v33 = vadd.f32 1.0, %v431_v30 }
  0xcd   :  { %v433_v32 = vpop.eup %432 }
  0xce   :  { %v435_v34 = vpop.eup %434  ;;  %v163_v35 = vmul.f32 %v433_v32, %v555_v2  ;;  %446 = vrcp.f32 %v143_v33 }
  0xcf   :  { %v161_v36 = vmul.f32 %v435_v34, %v565_v6 }
  0xd0   :  { %v183_v37 = vsel %vm79_vm0, %v163_v35, 0.0 }
  0xd1   :  { %v437_v38 = vpop.eup %436  ;;  %v184_v39 = vrot.slane %v183_v37, 4  ;;  %v169_v40 = vsel %vm79_vm0, %v161_v36, 0.0 }
  0xd2   :  { %v439_v41 = vpop.eup %438  ;;  %v170_v42 = vrot.slane %v169_v40, 4  ;;  %v164_v43 = vmul.f32 %v437_v38, %v567_v8 }
  0xd3   :  { %v185_v45 = vadd.f32 %v184_v39, %v183_v37  ;;  %v162_v46 = vmul.f32 %v439_v41, %v575_v13 }
  0xd4   :  { %v171_v47 = vadd.f32 %v170_v42, %v169_v40  ;;  %v190_v48 = vsel %vm79_vm0, %v164_v43, 0.0 }
  0xd5   :  { %v441_v2 = vpop.eup %440  ;;  %v186_v49 = vrot.slane %v185_v45, 2  ;;  %v191_v6 = vrot.slane %v190_v48, 4  ;;  %v176_v50 = vsel %vm79_vm0, %v162_v46, 0.0 }
  0xd6   :  { %v443_v51 = vpop.eup %442  ;;  %v172_v52 = vrot.slane %v171_v47, 2  ;;  %v177_v53 = vrot.slane %v176_v50, 4  ;;  %v166_v54 = vmul.f32 %v441_v2, %v581_v18 }
  0xd7   :  { %v192_v55 = vadd.f32 %v191_v6, %v190_v48  ;;  %v165_v56 = vmul.f32 %v443_v51, %v594_v31  ;;  %v187_v59 = vadd.f32 %v186_v49, %v185_v45 }
  0xd8   :  { %v173_v8 = vadd.f32 %v172_v52, %v171_v47  ;;  %v178_v57 = vadd.f32 %v177_v53, %v176_v50  ;;  %v204_v13 = vsel %vm79_vm0, %v166_v54, 0.0  ;;  %v371_v47 = vpop.permute.xlu0 %370 }
  0xd9   :  { %v445_v58 = vpop.eup %444  ;;  %v193_v61 = vrot.slane %v192_v55, 2  ;;  %v205_v62 = vrot.slane %v204_v13, 4  ;;  %v197_v63 = vsel %vm79_vm0, %v165_v56, 0.0  ;;  %v188_v15 = vrot.slane %v187_v59, 1 }
  0xda   :  { %v179_v0 = vrot.slane %v178_v57, 2  ;;  %v198_v3 = vrot.slane %v197_v63, 4  ;;  %v168_v5 = vmul.f32 %v445_v58, %v603_v44  ;;  %v174_v10 = vrot.slane %v173_v8, 1 }
  0xdb   :  { %v194_v7 = vadd.f32 %v193_v61, %v192_v55  ;;  %v206_v9 = vadd.f32 %v205_v62, %v204_v13  ;;  %v447_v18 = vpop.eup %446  ;;  %v189_v27 = vadd.f32 %v188_v15, %v187_v59 }
  0xdc   :  { %v180_v11 = vadd.f32 %v179_v0, %v178_v57  ;;  %v199_v31 = vadd.f32 %v198_v3, %v197_v63  ;;  %v218_v12 = vsel %vm79_vm0, %v168_v5, 0.0  ;;  %v167_v14 = vmul.f32 %v447_v18, %v612_v60 }
  0xdd   :  { %v207_v16 = vrot.slane %v206_v9, 2  ;;  %v219_v17 = vrot.slane %v218_v12, 4  ;;  %v195_v21 = vrot.slane %v194_v7, 1  ;;  %v175_v24 = vadd.f32 %v174_v10, %v173_v8 }
  0xde   :  { %v181_v19 = vrot.slane %v180_v11, 1  ;;  %v200_v20 = vrot.slane %v199_v31, 2  ;;  %v211_v23 = vsel %vm79_vm0, %v167_v14, 0.0 }
  0xdf   :  { %v208_v22 = vadd.f32 %v207_v16, %v206_v9  ;;  %v220_v44 = vadd.f32 %v219_v17, %v218_v12  ;;  %v212_v26 = vrot.slane %v211_v23, 4  ;;  %v196_v30 = vadd.f32 %v195_v21, %v194_v7 }
  0xe0   :  { %v182_v25 = vadd.f32 %v181_v19, %v180_v11  ;;  %v201_v4 = vadd.f32 %v200_v20, %v199_v31 }
  0xe1   :  { %v221_v1 = vrot.slane %v220_v44, 2  ;;  %v213_v29 = vadd.f32 %v212_v26, %v211_v23  ;;  %v209_v32 = vrot.slane %v208_v22, 1 }
  0xe2   :  { %v202_v28 = vrot.slane %v201_v4, 1  ;;  %v340_v60 = vsel %vm339_vm9, %v182_v25, %v175_v24 }
  0xe3   :  { %v222_v33 = vadd.f32 %v221_v1, %v220_v44  ;;  %v342_v34 = vsel %vm341_vm10, %v189_v27, %v340_v60  ;;  %v214_v36 = vrot.slane %v213_v29, 2  ;;  %v210_v40 = vadd.f32 %v209_v32, %v208_v22 }
  0xe4   :  { %v203_v35 = vadd.f32 %v202_v28, %v201_v4  ;;  %v344_v38 = vsel %vm343_vm11, %v196_v30, %v342_v34 }
  0xe5   :  { %v223_v37 = vrot.slane %v222_v33, 1  ;;  %v215_v39 = vadd.f32 %v214_v36, %v213_v29 }
  0xe6   :  { %v346_v42 = vsel %vm345_vm12, %v203_v35, %v344_v38 }
  0xe7   :  { %v216_v41 = vrot.slane %v215_v39, 1  ;;  %v224_v43 = vadd.f32 %v223_v37, %v222_v33  ;;  %v348_v46 = vsel %vm347_vm13, %v210_v40, %v346_v42 }
  0xe9   :  { %v217_v45 = vadd.f32 %v216_v41, %v215_v39 }
  0xeb   :  { %v350_v48 = vsel %vm349_vm14, %v217_v45, %v348_v46 }
  0xec   :  { %v352_v2 = vsel %vm351_vm15, %v224_v43, %v350_v48 }
  0xed   :  { %354 = vst.msk [vmem:[#allocation8] sm:$0xff] %vm79_vm0, %v352_v2 }
  0xee   :  { %374 = vst.msk [vmem:[#allocation8] sm:$0xff] %vm373_vm1, %v371_v47 }
  0xef   :  { %499 = shalt.err (!%p496_p0)
}
  0xf0   :  { %384 = dma.vmem_to_hbm [thread:$0]  %s382_s5, 128, %s665_s4, [#allocation5]  }
  0xf1   :  { %512 = dma.done.wait [#allocation5], 128  }
  0xf2   :  { %513 = vsyncadd [#allocation5], 4294967168 }
  0xf3   :  { %388 = vsyncpa [#allocation4], 1 }
  0xf4   :  { %389 = vsyncpa [#allocation7], 1 }
  0xf5   :  { %390 = vsyncpa [#allocation5], 1 }

</bundles_post_ra>
